<compile_context>
chip_gen: v7x
topology: tpu7x:2x2x1
jax: 0.10.0
libtpu: 0.0.40
codegen_flags: <defaults>
</compile_context>

<pallas_src>
import functools

import jax
import jax.numpy as jnp
from jax.experimental import pallas as pl
from jax.experimental.pallas import tpu as pltpu


def bilstm_dir_kernel(x_ref, wih_ref, whh_ref, b_ref, out_ref, gx_ref, *,
                      batch):
    """One grid step = one LSTM direction over the full (time-major) sequence.

    x_ref  : (T*B, D)   time-major inputs, row t*B + b  (shared by both dirs)
    wih_ref: (D, 4H)    pre-transposed input-to-hidden weights (this dir)
    whh_ref: (H, 4H)    pre-transposed hidden-to-hidden weights (this dir)
    b_ref  : (1, 4H)    combined bias b_ih + b_hh (this dir)
    out_ref: (T*B, H)   per-direction hidden states, stored at the real time t
    gx_ref : (T*B, 4H)  VMEM scratch holding the batched input projection
    """
    n_rows, _ = x_ref.shape
    T = n_rows // batch
    H = whh_ref.shape[0]
    d = pl.program_id(0)  # 0 = forward direction, 1 = reverse direction

    # Batched input projection for every (b, t) sample: one MXU GEMM.
    gx_ref[...] = (jnp.dot(x_ref[...], wih_ref[...],
                           preferred_element_type=jnp.float32)
                   + b_ref[...])

    whh = whh_ref[...]

    def step(s, carry):
        h, c = carry
        # Forward walks t = 0..T-1, reverse walks t = T-1..0.
        t = jnp.where(d == 0, s, T - 1 - s)
        row = t * batch
        g_x = gx_ref[pl.ds(row, batch), :]                         # (B, 4H)
        gates = g_x + jnp.dot(h, whh, preferred_element_type=jnp.float32)
        i_g = jax.nn.sigmoid(gates[:, 0 * H:1 * H])
        f_g = jax.nn.sigmoid(gates[:, 1 * H:2 * H])
        g_g = jnp.tanh(gates[:, 2 * H:3 * H])
        o_g = jax.nn.sigmoid(gates[:, 3 * H:4 * H])
        c_new = f_g * c + i_g * g_g
        h_new = o_g * jnp.tanh(c_new)
        out_ref[pl.ds(row, batch), :] = h_new.astype(out_ref.dtype)
        return h_new, c_new

    h0 = jnp.zeros((batch, H), jnp.float32)
    c0 = jnp.zeros((batch, H), jnp.float32)
    jax.lax.fori_loop(0, T, step, (h0, c0), unroll=True)


def bilstm_forward(x, w_ih, w_hh, b_ih, b_hh):
    """Bidirectional single-layer LSTM, batch_first, zero initial state.

    x: (B, T, D); w_ih: (2, 4H, D); w_hh: (2, 4H, H); b_ih, b_hh: (2, 4H).
    Returns (B, T, 2H) with [:, :, :H] = forward dir, [:, :, H:] = reverse dir
    (PyTorch layout).
    """
    B, T, D = x.shape
    H = w_hh.shape[2]
    G = 4 * H

    # Time-major, flattened so the in-kernel GEMM is a single (T*B, D)x(D, 4H).
    x_flat = jnp.transpose(x, (1, 0, 2)).reshape(T * B, D).astype(jnp.float32)
    # Pre-transpose weights once on the host side (row-major 'mk,kn->mn' feeds).
    w_ih_t = jnp.transpose(w_ih, (0, 2, 1)).astype(jnp.float32)   # (2, D, 4H)
    w_hh_t = jnp.transpose(w_hh, (0, 2, 1)).astype(jnp.float32)   # (2, H, 4H)
    bias = (b_ih + b_hh).reshape(2, 1, G).astype(jnp.float32)     # (2, 1, 4H)

    out = pl.pallas_call(
        functools.partial(bilstm_dir_kernel, batch=B),
        out_shape=jax.ShapeDtypeStruct((2, T * B, H), jnp.float32),
        grid_spec=pltpu.PrefetchScalarGridSpec(
            num_scalar_prefetch=0,
            grid=(2,),                                   # the two directions
            in_specs=[
                pl.BlockSpec((T * B, D), lambda d: (0, 0)),       # inputs
                pl.BlockSpec((None, D, G), lambda d: (d, 0, 0)),  # W_ih^T
                pl.BlockSpec((None, H, G), lambda d: (d, 0, 0)),  # W_hh^T
                pl.BlockSpec((None, 1, G), lambda d: (d, 0, 0)),  # bias
            ],
            out_specs=pl.BlockSpec((None, T * B, H), lambda d: (d, 0, 0)),
            scratch_shapes=[pltpu.VMEM((T * B, G), jnp.float32)],
        ),
        compiler_params=pltpu.CompilerParams(
            dimension_semantics=("parallel",)),
    )(x_flat, w_ih_t, w_hh_t, bias)

    # (2, T*B, H) -> (2, T, B, H) -> (B, T, 2, H) -> (B, T, 2H)
    out = out.reshape(2, T, B, H)
    return jnp.transpose(out, (2, 1, 0, 3)).reshape(B, T, 2 * H)


def lstm_a_v_forward(a_fea, v_fea, p_audio, p_video):
    """Forward pass of LSTM_A_V: returns (lstm_audio, lstm_video)."""
    lstm_audio = bilstm_forward(a_fea, p_audio['w_ih'], p_audio['w_hh'],
                                p_audio['b_ih'], p_audio['b_hh'])
    lstm_video = bilstm_forward(v_fea, p_video['w_ih'], p_video['w_hh'],
                                p_video['b_ih'], p_video['b_hh'])
    return lstm_audio, lstm_video


# ----------------------------- pure-JAX reference -----------------------------

def _lstm_dir_reference(x, w_ih, w_hh, b_ih, b_hh):
    B, T, _ = x.shape
    H = w_hh.shape[1]
    h = jnp.zeros((B, H), jnp.float32)
    c = jnp.zeros((B, H), jnp.float32)
    outs = []
    for t in range(T):
        gates = x[:, t] @ w_ih.T + b_ih + h @ w_hh.T + b_hh
        i = jax.nn.sigmoid(gates[:, 0:H])
        f = jax.nn.sigmoid(gates[:, H:2 * H])
        g = jnp.tanh(gates[:, 2 * H:3 * H])
        o = jax.nn.sigmoid(gates[:, 3 * H:4 * H])
        c = f * c + i * g
        h = o * jnp.tanh(c)
        outs.append(h)
    return jnp.stack(outs, axis=1)


def bilstm_reference(x, w_ih, w_hh, b_ih, b_hh):
    fwd = _lstm_dir_reference(x, w_ih[0], w_hh[0], b_ih[0], b_hh[0])
    bwd = _lstm_dir_reference(x[:, ::-1], w_ih[1], w_hh[1],
                              b_ih[1], b_hh[1])[:, ::-1]
    return jnp.concatenate([fwd, bwd], axis=-1)


def init_bilstm_params(key, in_dim, hidden):
    """PyTorch-style uniform(-1/sqrt(H), 1/sqrt(H)) init, both directions."""
    k = 1.0 / jnp.sqrt(jnp.float32(hidden))
    ks = jax.random.split(key, 4)
    u = lambda kk, shape: jax.random.uniform(kk, shape, jnp.float32, -k, k)
    return {
        'w_ih': u(ks[0], (2, 4 * hidden, in_dim)),
        'w_hh': u(ks[1], (2, 4 * hidden, hidden)),
        'b_ih': u(ks[2], (2, 4 * hidden)),
        'b_hh': u(ks[3], (2, 4 * hidden)),
    }


if __name__ == "__main__":
    # Small shapes consistent with the module (batch_first inputs of shape
    # (B, T, dim)).  Note: the original init_hidden allocates hidden states of
    # size a_dim, which only type-checks in PyTorch when a_dim == hidden_dim,
    # so we pick a_dim == hidden_dim; the hidden state is zeros either way.
    B, T = 2, 8
    A_DIM, V_DIM, HIDDEN = 32, 64, 32

    key = jax.random.PRNGKey(0)
    k_a, k_v, k_pa, k_pv = jax.random.split(key, 4)
    a_fea = jax.random.normal(k_a, (B, T, A_DIM), jnp.float32)
    v_fea = jax.random.normal(k_v, (B, T, V_DIM), jnp.float32)
    p_audio = init_bilstm_params(k_pa, A_DIM, HIDDEN)
    p_video = init_bilstm_params(k_pv, V_DIM, HIDDEN)

    lstm_audio, lstm_video = lstm_a_v_forward(a_fea, v_fea, p_audio, p_video)
    lstm_audio = jax.block_until_ready(lstm_audio)
    lstm_video = jax.block_until_ready(lstm_video)

    ref_a = bilstm_reference(a_fea, p_audio['w_ih'], p_audio['w_hh'],
                             p_audio['b_ih'], p_audio['b_hh'])
    ref_v = bilstm_reference(v_fea, p_video['w_ih'], p_video['w_hh'],
                             p_video['b_ih'], p_video['b_hh'])

    assert lstm_audio.shape == (B, T, 2 * HIDDEN)
    assert lstm_video.shape == (B, T, 2 * HIDDEN)
    assert jnp.allclose(lstm_audio, ref_a, atol=1e-4, rtol=1e-4), (
        f"audio max abs err {jnp.max(jnp.abs(lstm_audio - ref_a))}")
    assert jnp.allclose(lstm_video, ref_v, atol=1e-4, rtol=1e-4), (
        f"video max abs err {jnp.max(jnp.abs(lstm_video - ref_v))}")

    print("KERNEL_OK")
</pallas_src>

<mosaic_0001>
module attributes {stable_mosaic.version = 11 : i64} {
  func.func @bilstm_dir_kernel(%arg0: i32, %arg1: memref<16x32xf32, #tpu.memory_space<vmem>>, %arg2: memref<1x32x128xf32, #tpu.memory_space<vmem>>, %arg3: memref<1x32x128xf32, #tpu.memory_space<vmem>>, %arg4: memref<1x1x128xf32, #tpu.memory_space<vmem>>, %arg5: memref<1x16x32xf32, #tpu.memory_space<vmem>>, %arg6: memref<16x128xf32, #tpu.memory_space<vmem>>) attributes {dimension_semantics = [#tpu.dimension_semantics<parallel>], iteration_bounds = array<i64: 2>, scalar_prefetch = 0 : i64, scratch_operands = 1 : i64, tpu.core_type = #tpu.core_type<tc>, window_params = [{pipeline_mode = #tpu.pipeline_mode<synchronous>, transform_indices = @transform_0, window_bounds = array<i64: 16, 32>}, {transform_indices = @transform_1, window_bounds = array<i64: 1, 32, 128>}, {transform_indices = @transform_2, window_bounds = array<i64: 1, 32, 128>}, {transform_indices = @transform_3, window_bounds = array<i64: 1, 1, 128>}, {transform_indices = @transform_4, window_bounds = array<i64: 1, 16, 32>}]} {
    %c0 = arith.constant 0 : index
    %c0_0 = arith.constant 0 : index
    %0 = vector.load %arg1[%c0, %c0_0] : memref<16x32xf32, #tpu.memory_space<vmem>>, vector<16x32xf32>
    %c0_1 = arith.constant 0 : index
    %c0_2 = arith.constant 0 : index
    %c0_3 = arith.constant 0 : index
    %1 = vector.load %arg2[%c0_1, %c0_2, %c0_3] : memref<1x32x128xf32, #tpu.memory_space<vmem>>, vector<1x32x128xf32>
    %2 = vector.shape_cast %1 : vector<1x32x128xf32> to vector<32x128xf32>
    %cst = arith.constant dense<0.000000e+00> : vector<16x128xf32>
    %3 = tpu.matmul %0, %2, %cst {dimension_numbers = #tpu.dot_dimension_numbers<[1], [0], [0], [1], [0, 0, 1, 1], [], []>} : vector<16x32xf32>, vector<32x128xf32>, vector<16x128xf32> -> vector<16x128xf32>
    %c0_4 = arith.constant 0 : index
    %c0_5 = arith.constant 0 : index
    %c0_6 = arith.constant 0 : index
    %4 = vector.load %arg4[%c0_4, %c0_5, %c0_6] : memref<1x1x128xf32, #tpu.memory_space<vmem>>, vector<1x1x128xf32>
    %5 = vector.shape_cast %4 : vector<1x1x128xf32> to vector<1x128xf32>
    %6 = vector.broadcast %5 : vector<1x128xf32> to vector<16x128xf32>
    %7 = arith.addf %3, %6 : vector<16x128xf32>
    %c0_7 = arith.constant 0 : index
    %c0_8 = arith.constant 0 : index
    %8 = vector.load %arg6[%c0_7, %c0_8] : memref<16x128xf32, #tpu.memory_space<vmem>>, vector<16x128xf32>
    tpu.vector_store %arg6[%c0_7, %c0_8], %7 {strides = array<i32>} : memref<16x128xf32, #tpu.memory_space<vmem>>, vector<16x128xf32>,
    %c0_9 = arith.constant 0 : index
    %c0_10 = arith.constant 0 : index
    %c0_11 = arith.constant 0 : index
    %9 = vector.load %arg3[%c0_9, %c0_10, %c0_11] : memref<1x32x128xf32, #tpu.memory_space<vmem>>, vector<1x32x128xf32>
    %10 = vector.shape_cast %9 : vector<1x32x128xf32> to vector<32x128xf32>
    %cst_12 = arith.constant 0.000000e+00 : f32
    %11 = vector.broadcast %cst_12 : f32 to vector<2x32xf32>
    %cst_13 = arith.constant 0.000000e+00 : f32
    %12 = vector.broadcast %cst_13 : f32 to vector<2x32xf32>
    %c0_i32 = arith.constant 0 : i32
    %c0_i32_14 = arith.constant 0 : i32
    %13 = arith.cmpi eq, %arg0, %c0_i32_14 : i32
    %c7_i32 = arith.constant 7 : i32
    %14 = arith.subi %c7_i32, %c0_i32 : i32
    %15 = arith.select %13, %c0_i32, %14 : i32
    %c2_i32 = arith.constant 2 : i32
    %16 = arith.muli %15, %c2_i32 : i32
    %17 = arith.index_cast %16 : i32 to index
    %c0_15 = arith.constant 0 : index
    %18 = vector.load %arg6[%17, %c0_15] : memref<16x128xf32, #tpu.memory_space<vmem>>, vector<2x128xf32>
    %cst_16 = arith.constant dense<0.000000e+00> : vector<2x128xf32>
    %19 = tpu.matmul %11, %10, %cst_16 {dimension_numbers = #tpu.dot_dimension_numbers<[1], [0], [0], [1], [0, 0, 1, 1], [], []>} : vector<2x32xf32>, vector<32x128xf32>, vector<2x128xf32> -> vector<2x128xf32>
    %20 = arith.addf %18, %19 : vector<2x128xf32>
    %21 = vector.extract_strided_slice %20 {offsets = [0, 0], sizes = [2, 32], strides = [1, 1]} : vector<2x128xf32> to vector<2x32xf32>
    %22 = arith.negf %21 : vector<2x32xf32>
    %23 = math.exp %22 : vector<2x32xf32>
    %cst_17 = arith.constant 1.000000e+00 : f32
    %24 = vector.broadcast %cst_17 : f32 to vector<2x32xf32>
    %25 = arith.addf %24, %23 : vector<2x32xf32>
    %26 = arith.divf %24, %25 : vector<2x32xf32>
    %27 = vector.extract_strided_slice %20 {offsets = [0, 32], sizes = [2, 32], strides = [1, 1]} : vector<2x128xf32> to vector<2x32xf32>
    %28 = arith.negf %27 : vector<2x32xf32>
    %29 = math.exp %28 : vector<2x32xf32>
    %cst_18 = arith.constant 1.000000e+00 : f32
    %30 = vector.broadcast %cst_18 : f32 to vector<2x32xf32>
    %31 = arith.addf %30, %29 : vector<2x32xf32>
    %32 = arith.divf %30, %31 : vector<2x32xf32>
    %33 = vector.extract_strided_slice %20 {offsets = [0, 64], sizes = [2, 32], strides = [1, 1]} : vector<2x128xf32> to vector<2x32xf32>
    %34 = math.tanh %33 : vector<2x32xf32>
    %35 = vector.extract_strided_slice %20 {offsets = [0, 96], sizes = [2, 32], strides = [1, 1]} : vector<2x128xf32> to vector<2x32xf32>
    %36 = arith.negf %35 : vector<2x32xf32>
    %37 = math.exp %36 : vector<2x32xf32>
    %cst_19 = arith.constant 1.000000e+00 : f32
    %38 = vector.broadcast %cst_19 : f32 to vector<2x32xf32>
    %39 = arith.addf %38, %37 : vector<2x32xf32>
    %40 = arith.divf %38, %39 : vector<2x32xf32>
    %41 = arith.mulf %32, %12 : vector<2x32xf32>
    %42 = arith.mulf %26, %34 : vector<2x32xf32>
    %43 = arith.addf %41, %42 : vector<2x32xf32>
    %44 = math.tanh %43 : vector<2x32xf32>
    %45 = arith.mulf %40, %44 : vector<2x32xf32>
    %c0_20 = arith.constant 0 : index
    %46 = arith.index_cast %16 : i32 to index
    %c0_21 = arith.constant 0 : index
    %47 = vector.load %arg5[%c0_20, %46, %c0_21] : memref<1x16x32xf32, #tpu.memory_space<vmem>>, vector<1x2x32xf32>
    %48 = vector.shape_cast %47 : vector<1x2x32xf32> to vector<2x32xf32>
    %49 = vector.shape_cast %45 : vector<2x32xf32> to vector<1x2x32xf32>
    tpu.vector_store %arg5[%c0_20, %46, %c0_21], %49 {strides = array<i32>} : memref<1x16x32xf32, #tpu.memory_space<vmem>>, vector<1x2x32xf32>,
    %c1_i32 = arith.constant 1 : i32
    %c0_i32_22 = arith.constant 0 : i32
    %50 = arith.cmpi eq, %arg0, %c0_i32_22 : i32
    %c7_i32_23 = arith.constant 7 : i32
    %51 = arith.subi %c7_i32_23, %c1_i32 : i32
    %52 = arith.select %50, %c1_i32, %51 : i32
    %c2_i32_24 = arith.constant 2 : i32
    %53 = arith.muli %52, %c2_i32_24 : i32
    %54 = arith.index_cast %53 : i32 to index
    %c0_25 = arith.constant 0 : index
    %55 = vector.load %arg6[%54, %c0_25] : memref<16x128xf32, #tpu.memory_space<vmem>>, vector<2x128xf32>
    %cst_26 = arith.constant dense<0.000000e+00> : vector<2x128xf32>
    %56 = tpu.matmul %45, %10, %cst_26 {dimension_numbers = #tpu.dot_dimension_numbers<[1], [0], [0], [1], [0, 0, 1, 1], [], []>} : vector<2x32xf32>, vector<32x128xf32>, vector<2x128xf32> -> vector<2x128xf32>
    %57 = arith.addf %55, %56 : vector<2x128xf32>
    %58 = vector.extract_strided_slice %57 {offsets = [0, 0], sizes = [2, 32], strides = [1, 1]} : vector<2x128xf32> to vector<2x32xf32>
    %59 = arith.negf %58 : vector<2x32xf32>
    %60 = math.exp %59 : vector<2x32xf32>
    %cst_27 = arith.constant 1.000000e+00 : f32
    %61 = vector.broadcast %cst_27 : f32 to vector<2x32xf32>
    %62 = arith.addf %61, %60 : vector<2x32xf32>
    %63 = arith.divf %61, %62 : vector<2x32xf32>
    %64 = vector.extract_strided_slice %57 {offsets = [0, 32], sizes = [2, 32], strides = [1, 1]} : vector<2x128xf32> to vector<2x32xf32>
    %65 = arith.negf %64 : vector<2x32xf32>
    %66 = math.exp %65 : vector<2x32xf32>
    %cst_28 = arith.constant 1.000000e+00 : f32
    %67 = vector.broadcast %cst_28 : f32 to vector<2x32xf32>
    %68 = arith.addf %67, %66 : vector<2x32xf32>
    %69 = arith.divf %67, %68 : vector<2x32xf32>
    %70 = vector.extract_strided_slice %57 {offsets = [0, 64], sizes = [2, 32], strides = [1, 1]} : vector<2x128xf32> to vector<2x32xf32>
    %71 = math.tanh %70 : vector<2x32xf32>
    %72 = vector.extract_strided_slice %57 {offsets = [0, 96], sizes = [2, 32], strides = [1, 1]} : vector<2x128xf32> to vector<2x32xf32>
    %73 = arith.negf %72 : vector<2x32xf32>
    %74 = math.exp %73 : vector<2x32xf32>
    %cst_29 = arith.constant 1.000000e+00 : f32
    %75 = vector.broadcast %cst_29 : f32 to vector<2x32xf32>
    %76 = arith.addf %75, %74 : vector<2x32xf32>
    %77 = arith.divf %75, %76 : vector<2x32xf32>
    %78 = arith.mulf %69, %43 : vector<2x32xf32>
    %79 = arith.mulf %63, %71 : vector<2x32xf32>
    %80 = arith.addf %78, %79 : vector<2x32xf32>
    %81 = math.tanh %80 : vector<2x32xf32>
    %82 = arith.mulf %77, %81 : vector<2x32xf32>
    %c0_30 = arith.constant 0 : index
    %83 = arith.index_cast %53 : i32 to index
    %c0_31 = arith.constant 0 : index
    %84 = vector.load %arg5[%c0_30, %83, %c0_31] : memref<1x16x32xf32, #tpu.memory_space<vmem>>, vector<1x2x32xf32>
    %85 = vector.shape_cast %84 : vector<1x2x32xf32> to vector<2x32xf32>
    %86 = vector.shape_cast %82 : vector<2x32xf32> to vector<1x2x32xf32>
    tpu.vector_store %arg5[%c0_30, %83, %c0_31], %86 {strides = array<i32>} : memref<1x16x32xf32, #tpu.memory_space<vmem>>, vector<1x2x32xf32>,
    %c2_i32_32 = arith.constant 2 : i32
    %c0_i32_33 = arith.constant 0 : i32
    %87 = arith.cmpi eq, %arg0, %c0_i32_33 : i32
    %c7_i32_34 = arith.constant 7 : i32
    %88 = arith.subi %c7_i32_34, %c2_i32_32 : i32
    %89 = arith.select %87, %c2_i32_32, %88 : i32
    %c2_i32_35 = arith.constant 2 : i32
    %90 = arith.muli %89, %c2_i32_35 : i32
    %91 = arith.index_cast %90 : i32 to index
    %c0_36 = arith.constant 0 : index
    %92 = vector.load %arg6[%91, %c0_36] : memref<16x128xf32, #tpu.memory_space<vmem>>, vector<2x128xf32>
    %cst_37 = arith.constant dense<0.000000e+00> : vector<2x128xf32>
    %93 = tpu.matmul %82, %10, %cst_37 {dimension_numbers = #tpu.dot_dimension_numbers<[1], [0], [0], [1], [0, 0, 1, 1], [], []>} : vector<2x32xf32>, vector<32x128xf32>, vector<2x128xf32> -> vector<2x128xf32>
    %94 = arith.addf %92, %93 : vector<2x128xf32>
    %95 = vector.extract_strided_slice %94 {offsets = [0, 0], sizes = [2, 32], strides = [1, 1]} : vector<2x128xf32> to vector<2x32xf32>
    %96 = arith.negf %95 : vector<2x32xf32>
    %97 = math.exp %96 : vector<2x32xf32>
    %cst_38 = arith.constant 1.000000e+00 : f32
    %98 = vector.broadcast %cst_38 : f32 to vector<2x32xf32>
    %99 = arith.addf %98, %97 : vector<2x32xf32>
    %100 = arith.divf %98, %99 : vector<2x32xf32>
    %101 = vector.extract_strided_slice %94 {offsets = [0, 32], sizes = [2, 32], strides = [1, 1]} : vector<2x128xf32> to vector<2x32xf32>
    %102 = arith.negf %101 : vector<2x32xf32>
    %103 = math.exp %102 : vector<2x32xf32>
    %cst_39 = arith.constant 1.000000e+00 : f32
    %104 = vector.broadcast %cst_39 : f32 to vector<2x32xf32>
    %105 = arith.addf %104, %103 : vector<2x32xf32>
    %106 = arith.divf %104, %105 : vector<2x32xf32>
    %107 = vector.extract_strided_slice %94 {offsets = [0, 64], sizes = [2, 32], strides = [1, 1]} : vector<2x128xf32> to vector<2x32xf32>
    %108 = math.tanh %107 : vector<2x32xf32>
    %109 = vector.extract_strided_slice %94 {offsets = [0, 96], sizes = [2, 32], strides = [1, 1]} : vector<2x128xf32> to vector<2x32xf32>
    %110 = arith.negf %109 : vector<2x32xf32>
    %111 = math.exp %110 : vector<2x32xf32>
    %cst_40 = arith.constant 1.000000e+00 : f32
    %112 = vector.broadcast %cst_40 : f32 to vector<2x32xf32>
    %113 = arith.addf %112, %111 : vector<2x32xf32>
    %114 = arith.divf %112, %113 : vector<2x32xf32>
    %115 = arith.mulf %106, %80 : vector<2x32xf32>
    %116 = arith.mulf %100, %108 : vector<2x32xf32>
    %117 = arith.addf %115, %116 : vector<2x32xf32>
    %118 = math.tanh %117 : vector<2x32xf32>
    %119 = arith.mulf %114, %118 : vector<2x32xf32>
    %c0_41 = arith.constant 0 : index
    %120 = arith.index_cast %90 : i32 to index
    %c0_42 = arith.constant 0 : index
    %121 = vector.load %arg5[%c0_41, %120, %c0_42] : memref<1x16x32xf32, #tpu.memory_space<vmem>>, vector<1x2x32xf32>
    %122 = vector.shape_cast %121 : vector<1x2x32xf32> to vector<2x32xf32>
    %123 = vector.shape_cast %119 : vector<2x32xf32> to vector<1x2x32xf32>
    tpu.vector_store %arg5[%c0_41, %120, %c0_42], %123 {strides = array<i32>} : memref<1x16x32xf32, #tpu.memory_space<vmem>>, vector<1x2x32xf32>,
    %c3_i32 = arith.constant 3 : i32
    %c0_i32_43 = arith.constant 0 : i32
    %124 = arith.cmpi eq, %arg0, %c0_i32_43 : i32
    %c7_i32_44 = arith.constant 7 : i32
    %125 = arith.subi %c7_i32_44, %c3_i32 : i32
    %126 = arith.select %124, %c3_i32, %125 : i32
    %c2_i32_45 = arith.constant 2 : i32
    %127 = arith.muli %126, %c2_i32_45 : i32
    %128 = arith.index_cast %127 : i32 to index
    %c0_46 = arith.constant 0 : index
    %129 = vector.load %arg6[%128, %c0_46] : memref<16x128xf32, #tpu.memory_space<vmem>>, vector<2x128xf32>
    %cst_47 = arith.constant dense<0.000000e+00> : vector<2x128xf32>
    %130 = tpu.matmul %119, %10, %cst_47 {dimension_numbers = #tpu.dot_dimension_numbers<[1], [0], [0], [1], [0, 0, 1, 1], [], []>} : vector<2x32xf32>, vector<32x128xf32>, vector<2x128xf32> -> vector<2x128xf32>
    %131 = arith.addf %129, %130 : vector<2x128xf32>
    %132 = vector.extract_strided_slice %131 {offsets = [0, 0], sizes = [2, 32], strides = [1, 1]} : vector<2x128xf32> to vector<2x32xf32>
    %133 = arith.negf %132 : vector<2x32xf32>
    %134 = math.exp %133 : vector<2x32xf32>
    %cst_48 = arith.constant 1.000000e+00 : f32
    %135 = vector.broadcast %cst_48 : f32 to vector<2x32xf32>
    %136 = arith.addf %135, %134 : vector<2x32xf32>
    %137 = arith.divf %135, %136 : vector<2x32xf32>
    %138 = vector.extract_strided_slice %131 {offsets = [0, 32], sizes = [2, 32], strides = [1, 1]} : vector<2x128xf32> to vector<2x32xf32>
    %139 = arith.negf %138 : vector<2x32xf32>
    %140 = math.exp %139 : vector<2x32xf32>
    %cst_49 = arith.constant 1.000000e+00 : f32
    %141 = vector.broadcast %cst_49 : f32 to vector<2x32xf32>
    %142 = arith.addf %141, %140 : vector<2x32xf32>
    %143 = arith.divf %141, %142 : vector<2x32xf32>
    %144 = vector.extract_strided_slice %131 {offsets = [0, 64], sizes = [2, 32], strides = [1, 1]} : vector<2x128xf32> to vector<2x32xf32>
    %145 = math.tanh %144 : vector<2x32xf32>
    %146 = vector.extract_strided_slice %131 {offsets = [0, 96], sizes = [2, 32], strides = [1, 1]} : vector<2x128xf32> to vector<2x32xf32>
    %147 = arith.negf %146 : vector<2x32xf32>
    %148 = math.exp %147 : vector<2x32xf32>
    %cst_50 = arith.constant 1.000000e+00 : f32
    %149 = vector.broadcast %cst_50 : f32 to vector<2x32xf32>
    %150 = arith.addf %149, %148 : vector<2x32xf32>
    %151 = arith.divf %149, %150 : vector<2x32xf32>
    %152 = arith.mulf %143, %117 : vector<2x32xf32>
    %153 = arith.mulf %137, %145 : vector<2x32xf32>
    %154 = arith.addf %152, %153 : vector<2x32xf32>
    %155 = math.tanh %154 : vector<2x32xf32>
    %156 = arith.mulf %151, %155 : vector<2x32xf32>
    %c0_51 = arith.constant 0 : index
    %157 = arith.index_cast %127 : i32 to index
    %c0_52 = arith.constant 0 : index
    %158 = vector.load %arg5[%c0_51, %157, %c0_52] : memref<1x16x32xf32, #tpu.memory_space<vmem>>, vector<1x2x32xf32>
    %159 = vector.shape_cast %158 : vector<1x2x32xf32> to vector<2x32xf32>
    %160 = vector.shape_cast %156 : vector<2x32xf32> to vector<1x2x32xf32>
    tpu.vector_store %arg5[%c0_51, %157, %c0_52], %160 {strides = array<i32>} : memref<1x16x32xf32, #tpu.memory_space<vmem>>, vector<1x2x32xf32>,
    %c4_i32 = arith.constant 4 : i32
    %c0_i32_53 = arith.constant 0 : i32
    %161 = arith.cmpi eq, %arg0, %c0_i32_53 : i32
    %c7_i32_54 = arith.constant 7 : i32
    %162 = arith.subi %c7_i32_54, %c4_i32 : i32
    %163 = arith.select %161, %c4_i32, %162 : i32
    %c2_i32_55 = arith.constant 2 : i32
    %164 = arith.muli %163, %c2_i32_55 : i32
    %165 = arith.index_cast %164 : i32 to index
    %c0_56 = arith.constant 0 : index
    %166 = vector.load %arg6[%165, %c0_56] : memref<16x128xf32, #tpu.memory_space<vmem>>, vector<2x128xf32>
    %cst_57 = arith.constant dense<0.000000e+00> : vector<2x128xf32>
    %167 = tpu.matmul %156, %10, %cst_57 {dimension_numbers = #tpu.dot_dimension_numbers<[1], [0], [0], [1], [0, 0, 1, 1], [], []>} : vector<2x32xf32>, vector<32x128xf32>, vector<2x128xf32> -> vector<2x128xf32>
    %168 = arith.addf %166, %167 : vector<2x128xf32>
    %169 = vector.extract_strided_slice %168 {offsets = [0, 0], sizes = [2, 32], strides = [1, 1]} : vector<2x128xf32> to vector<2x32xf32>
    %170 = arith.negf %169 : vector<2x32xf32>
    %171 = math.exp %170 : vector<2x32xf32>
    %cst_58 = arith.constant 1.000000e+00 : f32
    %172 = vector.broadcast %cst_58 : f32 to vector<2x32xf32>
    %173 = arith.addf %172, %171 : vector<2x32xf32>
    %174 = arith.divf %172, %173 : vector<2x32xf32>
    %175 = vector.extract_strided_slice %168 {offsets = [0, 32], sizes = [2, 32], strides = [1, 1]} : vector<2x128xf32> to vector<2x32xf32>
    %176 = arith.negf %175 : vector<2x32xf32>
    %177 = math.exp %176 : vector<2x32xf32>
    %cst_59 = arith.constant 1.000000e+00 : f32
    %178 = vector.broadcast %cst_59 : f32 to vector<2x32xf32>
    %179 = arith.addf %178, %177 : vector<2x32xf32>
    %180 = arith.divf %178, %179 : vector<2x32xf32>
    %181 = vector.extract_strided_slice %168 {offsets = [0, 64], sizes = [2, 32], strides = [1, 1]} : vector<2x128xf32> to vector<2x32xf32>
    %182 = math.tanh %181 : vector<2x32xf32>
    %183 = vector.extract_strided_slice %168 {offsets = [0, 96], sizes = [2, 32], strides = [1, 1]} : vector<2x128xf32> to vector<2x32xf32>
    %184 = arith.negf %183 : vector<2x32xf32>
    %185 = math.exp %184 : vector<2x32xf32>
    %cst_60 = arith.constant 1.000000e+00 : f32
    %186 = vector.broadcast %cst_60 : f32 to vector<2x32xf32>
    %187 = arith.addf %186, %185 : vector<2x32xf32>
    %188 = arith.divf %186, %187 : vector<2x32xf32>
    %189 = arith.mulf %180, %154 : vector<2x32xf32>
    %190 = arith.mulf %174, %182 : vector<2x32xf32>
    %191 = arith.addf %189, %190 : vector<2x32xf32>
    %192 = math.tanh %191 : vector<2x32xf32>
    %193 = arith.mulf %188, %192 : vector<2x32xf32>
    %c0_61 = arith.constant 0 : index
    %194 = arith.index_cast %164 : i32 to index
    %c0_62 = arith.constant 0 : index
    %195 = vector.load %arg5[%c0_61, %194, %c0_62] : memref<1x16x32xf32, #tpu.memory_space<vmem>>, vector<1x2x32xf32>
    %196 = vector.shape_cast %195 : vector<1x2x32xf32> to vector<2x32xf32>
    %197 = vector.shape_cast %193 : vector<2x32xf32> to vector<1x2x32xf32>
    tpu.vector_store %arg5[%c0_61, %194, %c0_62], %197 {strides = array<i32>} : memref<1x16x32xf32, #tpu.memory_space<vmem>>, vector<1x2x32xf32>,
    %c5_i32 = arith.constant 5 : i32
    %c0_i32_63 = arith.constant 0 : i32
    %198 = arith.cmpi eq, %arg0, %c0_i32_63 : i32
    %c7_i32_64 = arith.constant 7 : i32
    %199 = arith.subi %c7_i32_64, %c5_i32 : i32
    %200 = arith.select %198, %c5_i32, %199 : i32
    %c2_i32_65 = arith.constant 2 : i32
    %201 = arith.muli %200, %c2_i32_65 : i32
    %202 = arith.index_cast %201 : i32 to index
    %c0_66 = arith.constant 0 : index
    %203 = vector.load %arg6[%202, %c0_66] : memref<16x128xf32, #tpu.memory_space<vmem>>, vector<2x128xf32>
    %cst_67 = arith.constant dense<0.000000e+00> : vector<2x128xf32>
    %204 = tpu.matmul %193, %10, %cst_67 {dimension_numbers = #tpu.dot_dimension_numbers<[1], [0], [0], [1], [0, 0, 1, 1], [], []>} : vector<2x32xf32>, vector<32x128xf32>, vector<2x128xf32> -> vector<2x128xf32>
    %205 = arith.addf %203, %204 : vector<2x128xf32>
    %206 = vector.extract_strided_slice %205 {offsets = [0, 0], sizes = [2, 32], strides = [1, 1]} : vector<2x128xf32> to vector<2x32xf32>
    %207 = arith.negf %206 : vector<2x32xf32>
    %208 = math.exp %207 : vector<2x32xf32>
    %cst_68 = arith.constant 1.000000e+00 : f32
    %209 = vector.broadcast %cst_68 : f32 to vector<2x32xf32>
    %210 = arith.addf %209, %208 : vector<2x32xf32>
    %211 = arith.divf %209, %210 : vector<2x32xf32>
    %212 = vector.extract_strided_slice %205 {offsets = [0, 32], sizes = [2, 32], strides = [1, 1]} : vector<2x128xf32> to vector<2x32xf32>
    %213 = arith.negf %212 : vector<2x32xf32>
    %214 = math.exp %213 : vector<2x32xf32>
    %cst_69 = arith.constant 1.000000e+00 : f32
    %215 = vector.broadcast %cst_69 : f32 to vector<2x32xf32>
    %216 = arith.addf %215, %214 : vector<2x32xf32>
    %217 = arith.divf %215, %216 : vector<2x32xf32>
    %218 = vector.extract_strided_slice %205 {offsets = [0, 64], sizes = [2, 32], strides = [1, 1]} : vector<2x128xf32> to vector<2x32xf32>
    %219 = math.tanh %218 : vector<2x32xf32>
    %220 = vector.extract_strided_slice %205 {offsets = [0, 96], sizes = [2, 32], strides = [1, 1]} : vector<2x128xf32> to vector<2x32xf32>
    %221 = arith.negf %220 : vector<2x32xf32>
    %222 = math.exp %221 : vector<2x32xf32>
    %cst_70 = arith.constant 1.000000e+00 : f32
    %223 = vector.broadcast %cst_70 : f32 to vector<2x32xf32>
    %224 = arith.addf %223, %222 : vector<2x32xf32>
    %225 = arith.divf %223, %224 : vector<2x32xf32>
    %226 = arith.mulf %217, %191 : vector<2x32xf32>
    %227 = arith.mulf %211, %219 : vector<2x32xf32>
    %228 = arith.addf %226, %227 : vector<2x32xf32>
    %229 = math.tanh %228 : vector<2x32xf32>
    %230 = arith.mulf %225, %229 : vector<2x32xf32>
    %c0_71 = arith.constant 0 : index
    %231 = arith.index_cast %201 : i32 to index
    %c0_72 = arith.constant 0 : index
    %232 = vector.load %arg5[%c0_71, %231, %c0_72] : memref<1x16x32xf32, #tpu.memory_space<vmem>>, vector<1x2x32xf32>
    %233 = vector.shape_cast %232 : vector<1x2x32xf32> to vector<2x32xf32>
    %234 = vector.shape_cast %230 : vector<2x32xf32> to vector<1x2x32xf32>
    tpu.vector_store %arg5[%c0_71, %231, %c0_72], %234 {strides = array<i32>} : memref<1x16x32xf32, #tpu.memory_space<vmem>>, vector<1x2x32xf32>,
    %c6_i32 = arith.constant 6 : i32
    %c0_i32_73 = arith.constant 0 : i32
    %235 = arith.cmpi eq, %arg0, %c0_i32_73 : i32
    %c7_i32_74 = arith.constant 7 : i32
    %236 = arith.subi %c7_i32_74, %c6_i32 : i32
    %237 = arith.select %235, %c6_i32, %236 : i32
    %c2_i32_75 = arith.constant 2 : i32
    %238 = arith.muli %237, %c2_i32_75 : i32
    %239 = arith.index_cast %238 : i32 to index
    %c0_76 = arith.constant 0 : index
    %240 = vector.load %arg6[%239, %c0_76] : memref<16x128xf32, #tpu.memory_space<vmem>>, vector<2x128xf32>
    %cst_77 = arith.constant dense<0.000000e+00> : vector<2x128xf32>
    %241 = tpu.matmul %230, %10, %cst_77 {dimension_numbers = #tpu.dot_dimension_numbers<[1], [0], [0], [1], [0, 0, 1, 1], [], []>} : vector<2x32xf32>, vector<32x128xf32>, vector<2x128xf32> -> vector<2x128xf32>
    %242 = arith.addf %240, %241 : vector<2x128xf32>
    %243 = vector.extract_strided_slice %242 {offsets = [0, 0], sizes = [2, 32], strides = [1, 1]} : vector<2x128xf32> to vector<2x32xf32>
    %244 = arith.negf %243 : vector<2x32xf32>
    %245 = math.exp %244 : vector<2x32xf32>
    %cst_78 = arith.constant 1.000000e+00 : f32
    %246 = vector.broadcast %cst_78 : f32 to vector<2x32xf32>
    %247 = arith.addf %246, %245 : vector<2x32xf32>
    %248 = arith.divf %246, %247 : vector<2x32xf32>
    %249 = vector.extract_strided_slice %242 {offsets = [0, 32], sizes = [2, 32], strides = [1, 1]} : vector<2x128xf32> to vector<2x32xf32>
    %250 = arith.negf %249 : vector<2x32xf32>
    %251 = math.exp %250 : vector<2x32xf32>
    %cst_79 = arith.constant 1.000000e+00 : f32
    %252 = vector.broadcast %cst_79 : f32 to vector<2x32xf32>
    %253 = arith.addf %252, %251 : vector<2x32xf32>
    %254 = arith.divf %252, %253 : vector<2x32xf32>
    %255 = vector.extract_strided_slice %242 {offsets = [0, 64], sizes = [2, 32], strides = [1, 1]} : vector<2x128xf32> to vector<2x32xf32>
    %256 = math.tanh %255 : vector<2x32xf32>
    %257 = vector.extract_strided_slice %242 {offsets = [0, 96], sizes = [2, 32], strides = [1, 1]} : vector<2x128xf32> to vector<2x32xf32>
    %258 = arith.negf %257 : vector<2x32xf32>
    %259 = math.exp %258 : vector<2x32xf32>
    %cst_80 = arith.constant 1.000000e+00 : f32
    %260 = vector.broadcast %cst_80 : f32 to vector<2x32xf32>
    %261 = arith.addf %260, %259 : vector<2x32xf32>
    %262 = arith.divf %260, %261 : vector<2x32xf32>
    %263 = arith.mulf %254, %228 : vector<2x32xf32>
    %264 = arith.mulf %248, %256 : vector<2x32xf32>
    %265 = arith.addf %263, %264 : vector<2x32xf32>
    %266 = math.tanh %265 : vector<2x32xf32>
    %267 = arith.mulf %262, %266 : vector<2x32xf32>
    %c0_81 = arith.constant 0 : index
    %268 = arith.index_cast %238 : i32 to index
    %c0_82 = arith.constant 0 : index
    %269 = vector.load %arg5[%c0_81, %268, %c0_82] : memref<1x16x32xf32, #tpu.memory_space<vmem>>, vector<1x2x32xf32>
    %270 = vector.shape_cast %269 : vector<1x2x32xf32> to vector<2x32xf32>
    %271 = vector.shape_cast %267 : vector<2x32xf32> to vector<1x2x32xf32>
    tpu.vector_store %arg5[%c0_81, %268, %c0_82], %271 {strides = array<i32>} : memref<1x16x32xf32, #tpu.memory_space<vmem>>, vector<1x2x32xf32>,
    %c7_i32_83 = arith.constant 7 : i32
    %c0_i32_84 = arith.constant 0 : i32
    %272 = arith.cmpi eq, %arg0, %c0_i32_84 : i32
    %c7_i32_85 = arith.constant 7 : i32
    %273 = arith.subi %c7_i32_85, %c7_i32_83 : i32
    %274 = arith.select %272, %c7_i32_83, %273 : i32
    %c2_i32_86 = arith.constant 2 : i32
    %275 = arith.muli %274, %c2_i32_86 : i32
    %276 = arith.index_cast %275 : i32 to index
    %c0_87 = arith.constant 0 : index
    %277 = vector.load %arg6[%276, %c0_87] : memref<16x128xf32, #tpu.memory_space<vmem>>, vector<2x128xf32>
    %cst_88 = arith.constant dense<0.000000e+00> : vector<2x128xf32>
    %278 = tpu.matmul %267, %10, %cst_88 {dimension_numbers = #tpu.dot_dimension_numbers<[1], [0], [0], [1], [0, 0, 1, 1], [], []>} : vector<2x32xf32>, vector<32x128xf32>, vector<2x128xf32> -> vector<2x128xf32>
    %279 = arith.addf %277, %278 : vector<2x128xf32>
    %280 = vector.extract_strided_slice %279 {offsets = [0, 0], sizes = [2, 32], strides = [1, 1]} : vector<2x128xf32> to vector<2x32xf32>
    %281 = arith.negf %280 : vector<2x32xf32>
    %282 = math.exp %281 : vector<2x32xf32>
    %cst_89 = arith.constant 1.000000e+00 : f32
    %283 = vector.broadcast %cst_89 : f32 to vector<2x32xf32>
    %284 = arith.addf %283, %282 : vector<2x32xf32>
    %285 = arith.divf %283, %284 : vector<2x32xf32>
    %286 = vector.extract_strided_slice %279 {offsets = [0, 32], sizes = [2, 32], strides = [1, 1]} : vector<2x128xf32> to vector<2x32xf32>
    %287 = arith.negf %286 : vector<2x32xf32>
    %288 = math.exp %287 : vector<2x32xf32>
    %cst_90 = arith.constant 1.000000e+00 : f32
    %289 = vector.broadcast %cst_90 : f32 to vector<2x32xf32>
    %290 = arith.addf %289, %288 : vector<2x32xf32>
    %291 = arith.divf %289, %290 : vector<2x32xf32>
    %292 = vector.extract_strided_slice %279 {offsets = [0, 64], sizes = [2, 32], strides = [1, 1]} : vector<2x128xf32> to vector<2x32xf32>
    %293 = math.tanh %292 : vector<2x32xf32>
    %294 = vector.extract_strided_slice %279 {offsets = [0, 96], sizes = [2, 32], strides = [1, 1]} : vector<2x128xf32> to vector<2x32xf32>
    %295 = arith.negf %294 : vector<2x32xf32>
    %296 = math.exp %295 : vector<2x32xf32>
    %cst_91 = arith.constant 1.000000e+00 : f32
    %297 = vector.broadcast %cst_91 : f32 to vector<2x32xf32>
    %298 = arith.addf %297, %296 : vector<2x32xf32>
    %299 = arith.divf %297, %298 : vector<2x32xf32>
    %300 = arith.mulf %291, %265 : vector<2x32xf32>
    %301 = arith.mulf %285, %293 : vector<2x32xf32>
    %302 = arith.addf %300, %301 : vector<2x32xf32>
    %303 = math.tanh %302 : vector<2x32xf32>
    %304 = arith.mulf %299, %303 : vector<2x32xf32>
    %c0_92 = arith.constant 0 : index
    %305 = arith.index_cast %275 : i32 to index
    %c0_93 = arith.constant 0 : index
    %306 = vector.load %arg5[%c0_92, %305, %c0_93] : memref<1x16x32xf32, #tpu.memory_space<vmem>>, vector<1x2x32xf32>
    %307 = vector.shape_cast %306 : vector<1x2x32xf32> to vector<2x32xf32>
    %308 = vector.shape_cast %304 : vector<2x32xf32> to vector<1x2x32xf32>
    tpu.vector_store %arg5[%c0_92, %305, %c0_93], %308 {strides = array<i32>} : memref<1x16x32xf32, #tpu.memory_space<vmem>>, vector<1x2x32xf32>,
    %c8_i32 = arith.constant 8 : i32
    return
  }
  func.func @transform_0(%arg0: i32) -> (i32, i32) {
    %c0_i32 = arith.constant 0 : i32
    %c0_i32_0 = arith.constant 0 : i32
    %c0_i32_1 = arith.constant 0 : i32
    return %c0_i32, %c0_i32_0 : i32, i32
  }
  func.func @transform_1(%arg0: i32) -> (i32, i32, i32) {
    %c0_i32 = arith.constant 0 : i32
    %c0_i32_0 = arith.constant 0 : i32
    %c0_i32_1 = arith.constant 0 : i32
    return %arg0, %c0_i32, %c0_i32_0 : i32, i32, i32
  }
  func.func @transform_2(%arg0: i32) -> (i32, i32, i32) {
    %c0_i32 = arith.constant 0 : i32
    %c0_i32_0 = arith.constant 0 : i32
    %c0_i32_1 = arith.constant 0 : i32
    return %arg0, %c0_i32, %c0_i32_0 : i32, i32, i32
  }
  func.func @transform_3(%arg0: i32) -> (i32, i32, i32) {
    %c0_i32 = arith.constant 0 : i32
    %c0_i32_0 = arith.constant 0 : i32
    %c0_i32_1 = arith.constant 0 : i32
    return %arg0, %c0_i32, %c0_i32_0 : i32, i32, i32
  }
  func.func @transform_4(%arg0: i32) -> (i32, i32, i32) {
    %c0_i32 = arith.constant 0 : i32
    %c0_i32_0 = arith.constant 0 : i32
    %c0_i32_1 = arith.constant 0 : i32
    return %arg0, %c0_i32, %c0_i32_0 : i32, i32, i32
  }
}

</mosaic_0001>

<bundles_post_ra>
// kernel: tpu_custom_call.1
= control target key start
LH: loop header
LB: loop body
LE: loop exit
PB: predicated region body
PF: predicated region fallthrough
CT: control target
= control target key end

     0   :  { %9 = vsyncpa [#allocation4], 0  ;;  %s2405_s0 = inlined_call_operand.hbm [shape: f32[16,32], index: 0, kind: input, shape index: {}]   ;;  %s2406_s1 = inlined_call_operand.hbm [shape: f32[2,32,128], index: 1, kind: input, shape index: {}]   ;;  %s2407_s2 = inlined_call_operand.hbm [shape: f32[2,32,128], index: 2, kind: input, shape index: {}]   ;;  %s2408_s3 = inlined_call_operand.vmem [shape: f32[2,1,128], index: 3, kind: input, shape index: {}]   ;;  %s2409_s4 = inlined_call_operand.hbm [shape: f32[2,16,32], index: 4, kind: output, shape index: {}]  }
   0x1   :  { %10 = vsyncpa [#allocation7], 0 }
   0x2   :  { %12 = vsyncpa [#allocation7 + $0x1], 0 }
   0x3   :  { %13 = vsyncpa [#allocation5], 0 }
   0x4   :  { %15 = vsyncpa [#allocation5 + $0x1], 0  ;;  %s1985_s15 = smov 0   ;;  %s1987_s16 = smov 0  }
   0x5   :  { %s1989_s17 = smov 0   ;;  %s1991_s18 = smov 0  }
   0x6 LB: > { %s2006_s19 = sadd.s32 1, %s1945_s18   ;;  %s49_s20 = sadd.s32 1, %s1941_s17  ;;  %s1945_s18 = sphi %s1991_s18, %s2440_s18   ;;  %s1941_s17 = sphi %s1989_s17, %s2439_s17   ;;  %s1937_s16 = sphi %s1987_s16, %s2438_s16   ;;  %s1933_s15 = sphi %s1985_s15, %s2437_s15  }
   0x7   : > { %s46_s21 = ssub.s32 %s1945_s18, %s2006_s19  ;;  %p56_p0 = scmp.ne.s32.totalorder %s1941_s17, %s1937_s16 }
   0x8   : > { %p47_p1 = scmp.eq.s32.totalorder %s46_s21, 0  ;;  %p57_p2 = scmp.eq.s32.totalorder %s1945_s18, 0 }
   0x9   : > { %p1678_p5 = scmp.lt.s32.totalorder %s1945_s18, 2  ;;  %s177_s23 = sand.u32 1, %s1945_s18  }
   0xa   : > { %s2015_s22 = scalar_select %p47_p1, %s1941_s17, %s49_s20  }
   0xb   : > { %p58_p3 = por %p57_p2, %p56_p0  ;;  %s179_s24 = sand.u32 1, %s1941_s17  }
   0xc   : > { %s2024_s25 = sshll.u32 %s179_s24, 5  ;;  %s1448_s26 = sshll.u32 %s1945_s18, 9 }
   0xd   : > { %s2032_s29 = scalar_lea.hbm %s2406_s1, %s1448_s26  ;;  %s181_s30 = scalar_lea.vmem [#allocation6], %s2024_s25 }
   0xe   : > { %s188_s5 = sshll.u32 %s181_s30, 4  ;;  %p2035_p6 = pnand %p1678_p5, %p58_p3  ;;  %s2039_s5 = int_to_ptr.vmem [resolvable:$true] %s188_s5 }
   0xf   : > { %s2041_s7 = scalar_lea.sflag [#allocation7], %s177_s23  ;;  %s1787_s8 = scalar_lea.hbm %s2032_s29, 512 }
  0x10   : > { %p1788_p7 = scmp.ne.s32.totalorder %s2032_s29, %s1787_s8  ;;  %p1789_p8 = pneg %p2035_p6 }
  0x11   : > { %s1792_s11 = scalar_lea.hbm %s2406_s1, 1024  ;;  %p1793_p11 = scmp.lt.u32.totalorder %s2032_s29, %s2406_s1 }
  0x12   : > { %p1790_p9 = pnand %p1789_p8, %p1788_p7  ;;  %p1794_p12 = scmp.lt.u32.totalorder %s1792_s11, %s1787_s8 }
  0x13   : > { %p1796_p1 = scmp.lt.u32.totalorder %s1787_s8, %s2032_s29 }
  0x14   : > { %p1791_p10 = pneg %p1790_p9  ;;  %p1795_p13 = por %p1794_p12, %p1793_p11 }
  0x16   : > { %p1797_p2 = por %p1796_p1, %p1795_p13 }
  0x18   : > { %p1798_p3 = pnand %p1797_p2, %p1791_p10 }
  0x1a   : > { %1801 = shalt.err (!%p1798_p3)
}
  0x1b   : > { %s1802_s14 = scalar_lea.vmem %s2039_s5, 512  ;;  %s1947_s20 = smov [#allocation6]  }
  0x1c   : > { %p1803_p5 = scmp.ne.s32.totalorder %s2039_s5, %s1802_s14  ;;  %s1807_s21 = sshll.u32 %s1947_s20, 4  ;;  %s1808_s21 = int_to_ptr.vmem [resolvable:$false] %s1807_s21 }
  0x1d   : > { %s1809_s23 = scalar_lea.vmem %s1808_s21, 1024  ;;  %p1810_p4 = scmp.lt.s32.totalorder %s2039_s5, %s1808_s21 }
  0x1e   : > { %p1805_p7 = pnand %p1803_p5, %p1789_p8  ;;  %p1811_p11 = scmp.lt.s32.totalorder %s1809_s23, %s1802_s14 }
  0x20   : > { %p1806_p9 = pneg %p1805_p7  ;;  %p1812_p12 = por %p1811_p11, %p1810_p4 }
  0x22   : > { %p1813_p13 = pnand %p1812_p12, %p1806_p9 }
  0x24   : > { %1816 = shalt.err (!%p1813_p13)
}
  0x25   : > { %s1948_s24 = smov 128   ;;  %s1949_s27 = smov 8  }
  0x26   : > { %1669 = dma.hbm_to_vmem [thread:$0]  (!%p2035_p6), %s2032_s29, 512, %s2039_s5, %s2041_s7, %s1948_s24, %s1948_s24, %s1949_s27  }
  0x27   : > { %s202_s28 = scalar_lea.vmem [#allocation8], %s2024_s25  ;;  %s2074_s8 = sadd.s32 4294967295, %s1945_s18  }
  0x28   : > { %s209_s30 = sshll.u32 %s202_s28, 4  ;;  %s1402_s9 = sadd.s32 4294967294, %s1945_s18   ;;  %s2107_s30 = int_to_ptr.vmem [resolvable:$true] %s209_s30 }
  0x29   : > { %p62_p4 = scmp.ne.s32.totalorder %s1937_s16, %s1933_s15  ;;  %p2410_p10 = scmp.eq.s32.totalorder %s2074_s8, 0 }
  0x2a   : > { %p138_p1 = scmp.eq.s32.totalorder %s2074_s8, 1  ;;  %p144_p2 = scmp.eq.s32.totalorder %s1402_s9, 1 }
  0x2b   : > { %p2083_p3 = por %p2410_p10, %p62_p4  ;;  %p1403_p5 = scmp.ge.s32.totalorder %s1945_s18, 1 }
  0x2c   : > { %p2091_p7 = por %p138_p1, %p56_p0  ;;  %p2095_p9 = por %p144_p2, %p62_p4 }
  0x2d   : > { %s2415_s10 = scalar_select %p2083_p3, 1, 0 }
  0x2e   : > { %s2416_s25 = scalar_select %p2091_p7, 1, 0 }
  0x2f   : > { %s2417_s29 = scalar_select %p2095_p9, 1, 0 }
  0x30   : > { %p151_p11 = scmp.lt.s32.totalorder %s1945_s18, 3  ;;  %s2105_s12 = scalar_lea.hbm %s2407_s2, %s1448_s26 }
  0x31   : > { %s1950_s14 = smov [#allocation3]   ;;  %s1817_s21 = scalar_lea.hbm %s2105_s12, 512 }
  0x32   : > { %p2109_p0 = pnand %p1403_p5, %p151_p11  ;;  %s2113_s20 = sshll.u32 %s1950_s14, 4  ;;  %s164_s20 = int_to_ptr.vmem [resolvable:$true] %s2113_s20 }
  0x33   : > { %p1818_p13 = scmp.ne.s32.totalorder %s2105_s12, %s1817_s21  ;;  %s1822_s28 = scalar_lea.hbm %s2407_s2, 1024 }
  0x34   : > { %s2418_s13 = scalar_select %p2109_p0, 1, 0 }
  0x35   : > { %p1820_p4 = pnand %p1818_p13, %p1789_p8  ;;  %p1823_p2 = scmp.lt.u32.totalorder %s2105_s12, %s2407_s2 }
  0x36   : > { %p1824_p5 = scmp.lt.u32.totalorder %s1822_s28, %s1817_s21  ;;  %p1826_p10 = scmp.lt.u32.totalorder %s1817_s21, %s2105_s12 }
  0x37   : > { %p1821_p1 = pneg %p1820_p4 }
  0x38   : > { %p1825_p11 = por %p1824_p5, %p1823_p2 }
  0x3a   : > { %p1827_p9 = por %p1826_p10, %p1825_p11 }
  0x3c   : > { %p1828_p7 = pnand %p1827_p9, %p1821_p1 }
  0x3e   : > { %1831 = shalt.err (!%p1828_p7)
}
  0x3f   : > { %s1832_s11 = scalar_lea.vmem %s2107_s30, 512  ;;  %s1951_s14 = smov [#allocation8]  }
  0x40   : > { %p1833_p13 = scmp.ne.s32.totalorder %s2107_s30, %s1832_s11  ;;  %s1837_s26 = sshll.u32 %s1951_s14, 4  ;;  %s1838_s26 = int_to_ptr.vmem [resolvable:$false] %s1837_s26 }
  0x41   : > { %s1839_s23 = scalar_lea.vmem %s1838_s26, 1024  ;;  %p1840_p3 = scmp.lt.s32.totalorder %s2107_s30, %s1838_s26 }
  0x42   : > { %p1835_p4 = pnand %p1833_p13, %p1789_p8  ;;  %p1841_p2 = scmp.lt.s32.totalorder %s1839_s23, %s1832_s11 }
  0x44   : > { %p1836_p12 = pneg %p1835_p4  ;;  %p1842_p5 = por %p1841_p2, %p1840_p3 }
  0x46   : > { %p1843_p10 = pnand %p1842_p5, %p1836_p12 }
  0x48   : > { %1846 = shalt.err (!%p1843_p10)
}
  0x49   : > { %1672 = dma.hbm_to_vmem [thread:$0]  (!%p2035_p6), %s2105_s12, 512, %s2107_s30, %s2041_s7, %s1948_s24, %s1948_s24, %s1949_s27  }
  0x4a   : > { %p2419_p8 = scmp.eq.s32.totalorder %s2074_s8, 0  ;;  %p2420_p7 = pneg %p2109_p0 }
  0x4b   : > { %s1847_s9 = scalar_lea.hbm %s2405_s0, 256 }
  0x4c   : > { %p2150_p9 = pnand %p2420_p7, %p2419_p8  ;;  %p1848_p3 = scmp.ne.s32.totalorder %s2405_s0, %s1847_s9 }
  0x4d   : > { %p1854_p11 = scmp.lt.u32.totalorder %s1847_s9, %s2405_s0 }
  0x4e   : > { %p1849_p12 = pneg %p2150_p9 }
  0x50   : > { %p1850_p6 = pnand %p1849_p12, %p1848_p3 }
  0x52   : > { %p1851_p1 = pneg %p1850_p6 }
  0x54   : > { %p1856_p13 = pnand %p1854_p11, %p1851_p1 }
  0x56   : > { %1859 = shalt.err (!%p1856_p13)
}
  0x57   : > { %s1860_s12 = scalar_lea.vmem %s164_s20, 256  ;;  %p1868_p10 = scmp.lt.s32.totalorder %s164_s20, %s164_s20 }
  0x58   : > { %p1861_p4 = scmp.ne.s32.totalorder %s164_s20, %s1860_s12  ;;  %p1869_p8 = scmp.lt.s32.totalorder %s1860_s12, %s1860_s12 }
  0x5a   : > { %p1863_p2 = pnand %p1861_p4, %p1849_p12  ;;  %p1870_p7 = por %p1869_p8, %p1868_p10 }
  0x5c   : > { %p1864_p5 = pneg %p1863_p2 }
  0x5e   : > { %p1871_p0 = pnand %p1870_p7, %p1864_p5 }
  0x60   : > { %1874 = shalt.err (!%p1871_p0)
}
  0x61   : > { %1665 = dma.hbm_to_vmem [thread:$0]  (!%p2150_p9), %s2405_s0, 256, %s164_s20, [#allocation4], %s1948_s24, %s1948_s24, %s1949_s27  }
  0x62   : > { %p2422_p3 = scmp.ne.s32.totalorder %s2418_s13, 0 }
  0x63   : > { %p2423_p12 = scmp.eq.s32.totalorder (!%p2422_p3), %s2074_s8, 0 }
  0x64   : > { %227 = sbr.rel (%p2422_p3) target bundleno = 5767 (0x1687), region = 36 }
  0x6b   : > { %1920 = dma.done.wait (%p2423_p12), [#allocation4], 256   ;;  %p2424_p6 = pmov %p2423_p12 }
  0x6c   : > { %s233_s23 = sand.u32 1, %s2074_s8   ;;  %s2181_s21 = sand.u32 1, %s1937_s16  }
  0x6d   : > { %1922 = vsyncadd (%p2424_p6), [#allocation4], 4294967040  ;;  %s1414_s28 = sshll.u32 %s2181_s21, 5  ;;  %s234_s6 = scalar_lea.sflag [#allocation7], %s233_s23 }
  0x6e   : > { %s237_s9 = scalar_lea.vmem [#allocation6], %s1414_s28  ;;  %p2425_p0 = scmp.ne.s32.totalorder %s2415_s10, 0 }
  0x70   : > { %1924 = dma.done.wait (%p2425_p0), %s234_s6, 1024  }
  0x71   : > { %1926 = vsyncadd (%p2425_p0), %s234_s6, 4294966272  ;;  %v1952_v0 = vmov 0.0|0.0   ;;  %vm1953_vm0 = vmmov 0   ;;  %v1954_v1 = vmov 0.0   ;;  %vm295_vm1 = vcmask 261120   ;;  %v284_v2 = vld [vmem:[%s237_s9] sm:$0xff]  ;;  %p2426_p1 = pmov %p2424_p6 }
  0x72   : > { %1604 = vmatprep.subr.bf16.mxu1 %v1952_v0  ;;  %1516 = vmatprep.mubr.msk.f32.mxu1 %vm1953_vm0, %v1954_v1  ;;  %v285_v3 = vld [vmem:[%s237_s9 + $0x8] sm:$0xff]  ;;  %v286_v4 = vld [vmem:[%s237_s9 + $0x10] sm:$0xff]  ;;  %v287_v6 = vld [vmem:[%s237_s9 + $0x18] sm:$0xff]  ;;  %s246_s24 = scalar_lea.vmem [#allocation8], %s1414_s28  ;;  %p279_p9 = scmp.lt.s32.totalorder %s2074_s8, 1  ;;  %vm491_vm2 = vcmask 254976  }
  0x73   : > { %v1596_v5 = vpack.c.bf16 %v285_v3, %v284_v2  ;;  %v282_v7 = vld [vmem:[#allocation3] sm:$0xff]  ;;  %v1600_v8 = vpack.c.bf16 %v287_v6, %v286_v4  ;;  %v379_v9 = vld [vmem:[%s246_s24] sm:$0xff]  ;;  %v380_v10 = vld [vmem:[%s246_s24 + $0x8] sm:$0xff]  ;;  %s2222_s5 = scalar_select %p2426_p1, 0, 7 }
  0x74   : > { %1505 = vmatprep.mubr.msk.f32.mxu0 %vm295_vm1, %v282_v7  ;;  %v381_v11 = vld [vmem:[%s246_s24 + $0x10] sm:$0xff]  ;;  %v2192_v12 = vpack.c.bf16 %v380_v10, %v379_v9  ;;  %v382_v13 = vld [vmem:[%s246_s24 + $0x18] sm:$0xff]  ;;  %s280_s27 = scalar_select %p279_p9, %s2074_s8, 1 }
  0x75   : > { %1597 = vmatprep.subr.bf16.mxu0 %v1596_v5  ;;  %v2195_v14 = vpack.c.bf16 %v382_v13, %v381_v11  ;;  %v283_v15 = vld [vmem:[#allocation3 + $0x8] sm:$0xff]  ;;  %s1420_s11 = sshll.u32 %s2222_s5, 1  ;;  %s1955_s30 = smov 64  }
  0x76   : > { %1599 = vmatpush3.bf16.msra.mxu0 %v1596_v5  ;;  %1606 = vmatpush3.bf16.msra.mxu1 %v2192_v12  ;;  %s281_s20 = scalar_lea.vmem %s2408_s3, %s280_s27  ;;  %s386_s7 = scalar_lea.vmem [#allocation2], %s1420_s11 }
  0x77   : > { %1601 = vmatprep.subr.bf16.mxu0 %v1600_v8  ;;  %1607 = vmatprep.subr.bf16.mxu1 %v1952_v0  ;;  %v1417_v16 = vld [vmem:[%s281_s20] ss:$0 sm:$0xff]  ;;  %s1956_s12 = smov 32   ;;  %s1416_s14 = sshll.u32 %s2181_s21, 4 }
  0x78   : > { %s2232_s26 = scalar_lea.vmem [#allocation9], %s1416_s14  ;;  %p2427_p11 = pmov %p2426_p1 }
  0x79   : > { %s490_s23 = scalar_lea.vmem %s2232_s26, %s1420_s11 [#allocation9]  ;;  %p2428_p13 = pmov %p2426_p1 }
  0x7a   : > { %1603 = vmatpush3.bf16.msra.mxu0 %v1600_v8  ;;  %1609 = vmatpush3.bf16.msra.mxu1 %v2195_v14  ;;  %s2247_s28 = scalar_select %p2427_p11, 1, 6 }
  0x7b   : > { %1610 = vmatprep.subr.bf16.mxu0 %v1952_v0  ;;  %1616 = vmatprep.subr.bf16.mxu1 %v1952_v0  ;;  %s2265_s27 = scalar_select %p2428_p13, 2, 5 }
  0x7c   : > { %s1422_s6 = sshll.u32 %s2247_s28, 1  ;;  %p2429_p4 = pmov %p2426_p1 }
  0x7d   : > { %1506 = vmatmul.mubr.msk.f32.vlgmr.msra.gmra.mrb[0].mxu0 %vm295_vm1, %v283_v15  ;;  %1517 = vmatmul.mubr.f32.vlgmr.msra.gmra.mrb[0].mxu1 %v1954_v1  ;;  %s495_s9 = scalar_lea.vmem [#allocation2], %s1422_s6  ;;  %s598_s24 = scalar_lea.vmem %s2232_s26, %s1422_s6 [#allocation9] }
  0x7e   : > { %1612 = vmatpush3.bf16.msra.mxu0 %v2192_v12  ;;  %1527 = vmatprep.mubr.msk.f32.mxu0 %vm1953_vm0, %v1954_v1  ;;  %s1425_s10 = sshll.u32 %s2265_s27, 1  ;;  %p2430_p2 = pmov %p2426_p1 }
  0x7f   : > { %1613 = vmatprep.subr.bf16.mxu0 %v1952_v0  ;;  %1618 = vmatpush3.bf16.msra.mxu1 %v2192_v12  ;;  %s602_s13 = scalar_lea.vmem [#allocation2], %s1425_s10  ;;  %s705_s20 = scalar_lea.vmem %s2232_s26, %s1425_s10 [#allocation9] }
  0x80   : > { %1538 = vmatprep.mubr.msk.f32.mxu1 %vm1953_vm0, %v1954_v1  ;;  %1619 = vmatprep.subr.bf16.mxu1 %v1952_v0  ;;  %s2283_s5 = scalar_select %p2429_p4, 3, 4 }
  0x81   : > { %p2431_p5 = pmov %p2426_p1  ;;  %p2432_p10 = pmov %p2426_p1 }
  0x82   : > { %1615 = vmatpush3.bf16.msra.mxu0 %v2195_v14  ;;  %s1428_s11 = sshll.u32 %s2283_s5, 1  ;;  %p2433_p8 = pmov %p2426_p1 }
  0x83   : > { %1622 = vmatprep.subr.bf16.mxu0 %v1952_v0  ;;  %1621 = vmatpush3.bf16.msra.mxu1 %v2195_v14  ;;  %s812_s14 = scalar_lea.vmem %s2232_s26, %s1428_s11 [#allocation9]  ;;  %p2434_p3 = scmp.ne.s32.totalorder %s2416_s25, 0 }
  0x84   : > { %1628 = vmatprep.subr.bf16.mxu1 %v1952_v0 }
 0x150   : > { %v1507_v17 = vpop.f32.mrb[0].mxu0  ;;  %v457_v20 = vpop.f32.mrb[0].mxu1 }
 0x151   : > { %v374_v18 = vadd.f32 %v1507_v17, %v1417_v16  ;;  %v368_v19 = vpop.f32.mrb[1].mxu0  ;;  %v1518_v22 = vpop.f32.mrb[1].mxu1 }
 0x152   : > { %v369_v21 = vadd.f32 %v1417_v16, %v368_v19 }
 0x153   : > { %378 = vst [vmem:[#allocation2 + $0x8] sm:$0xff] %v374_v18 }
 0x154   : > { %377 = vst [vmem:[#allocation2] sm:$0xff] %v369_v21 }
 0x15b   : > { %v387_v23 = vld [vmem:[%s386_s7] sm:$0x3]  ;;  %s709_s7 = scalar_lea.vmem [#allocation2], %s1428_s11 }
 0x15c   : > { %v461_v24 = vadd.f32 %v457_v20, %v387_v23  ;;  %v496_v39 = vld [vmem:[%s495_s9] sm:$0x3] }
 0x15d   : > { %v603_v57 = vld [vmem:[%s602_s13] sm:$0x3] }
 0x15e   : > { %1723 = vtanh.f32 %v461_v24  ;;  %v1421_v26 = vmul.f32 -1.442695, %v461_v24  ;;  %v710_v15 = vld [vmem:[%s709_s7] sm:$0x3] }
 0x160   : > { %1725 = vpow2.f32 %v1421_v26 }
 0x168   : > { %v1724_v25 = vpop.eup %1723 }
 0x169   : > { %471 = vrot.lane.b32.xlu0 %v1724_v25, %s1955_s30 }
 0x16a   : > { %v1726_v27 = vpop.eup %1725 }
 0x16b   : > { %v465_v28 = vadd.f32 1.0, %v1726_v27 }
 0x16d   : > { %1727 = vrcp.f32 %v465_v28 }
 0x177   : > { %v1728_v29 = vpop.eup %1727 }
 0x178   : > { %v469_v32 = vmul.f32 0.0, %v1728_v29 }
 0x1db   : > { %v472_v30 = vpop.permute.xlu0 %471 }
 0x1dc   : > { %v474_v31 = vmul.f32 %v1728_v29, %v472_v30 }
 0x1de   : > { %476 = vrot.lane.b32.xlu0 %v474_v31, %s1956_s12 }
 0x250   : > { %v477_v33 = vpop.permute.xlu0 %476 }
 0x251   : > { %v479_v34 = vadd.f32 %v477_v33, %v469_v32 }
 0x253   : > { %1729 = vtanh.f32 %v479_v34 }
 0x25d   : > { %v1730_v35 = vpop.eup %1729 }
 0x25e   : > { %482 = vrot.lane.b32.xlu1 %v1730_v35, %s1955_s30 }
 0x2d0   : > { %v483_v36 = vpop.permute.xlu1 %482 }
 0x2d1   : > { %v485_v37 = vmul.f32 %v1728_v29, %v483_v36 }
 0x2d3   : > { %487 = vrot.lane.b32.xlu1 %v485_v37, %s1956_s12 }
 0x345   : > { %v488_v38 = vpop.permute.xlu1 %487 }
 0x346   : > { %492 = vst.msk [vmem:[%s490_s23] sm:$0x3] %vm491_vm2, %v488_v38  ;;  %1528 = vmatmul.mubr.msk.f32.vlgmr.msra.gmra.mrb[2].mxu0 %vm295_vm1, %v488_v38  ;;  %s2300_s23 = scalar_select %p2430_p2, 4, 3 }
 0x347   : > { %1624 = vmatpush3.bf16.msra.mxu0 %v2192_v12  ;;  %1549 = vmatprep.mubr.msk.f32.mxu0 %vm1953_vm0, %v1954_v1 }
 0x348   : > { %1625 = vmatprep.subr.bf16.mxu0 %v1952_v0  ;;  %s1431_s28 = sshll.u32 %s2300_s23, 1 }
 0x349   : > { %s816_s6 = scalar_lea.vmem [#allocation2], %s1431_s28  ;;  %s919_s9 = scalar_lea.vmem %s2232_s26, %s1431_s28 [#allocation9] }
 0x34a   : > { %v817_v33 = vld [vmem:[%s816_s6] sm:$0x3]  ;;  %s1450_s6 = sshll.u32 %s2074_s8, 8  ;;  %s1957_s8 = smov [#allocation9]  }
 0x34b   : > { %1627 = vmatpush3.bf16.msra.mxu0 %v2195_v14 }
 0x34c   : > { %1634 = vmatprep.subr.bf16.mxu0 %v1952_v0 }
 0x419   : > { %v565_v40 = vpop.f32.mrb[2].mxu0 }
 0x41a   : > { %v569_v41 = vadd.f32 %v565_v40, %v496_v39  ;;  %v1529_v42 = vpop.f32.mrb[3].mxu0 }
 0x41c   : > { %1731 = vtanh.f32 %v569_v41  ;;  %v1424_v44 = vmul.f32 -1.442695, %v569_v41 }
 0x41e   : > { %1733 = vpow2.f32 %v1424_v44 }
 0x426   : > { %v1732_v43 = vpop.eup %1731 }
 0x427   : > { %579 = vrot.lane.b32.xlu0 %v1732_v43, %s1955_s30 }
 0x428   : > { %v1734_v45 = vpop.eup %1733 }
 0x429   : > { %v573_v46 = vadd.f32 1.0, %v1734_v45 }
 0x42b   : > { %1735 = vrcp.f32 %v573_v46 }
 0x435   : > { %v1736_v47 = vpop.eup %1735 }
 0x436   : > { %v577_v50 = vmul.f32 %v1736_v47, %v479_v34 }
 0x499   : > { %v580_v48 = vpop.permute.xlu0 %579 }
 0x49a   : > { %v582_v49 = vmul.f32 %v1736_v47, %v580_v48 }
 0x49c   : > { %584 = vrot.lane.b32.xlu1 %v582_v49, %s1956_s12 }
 0x50e   : > { %v585_v51 = vpop.permute.xlu1 %584 }
 0x50f   : > { %v587_v52 = vadd.f32 %v585_v51, %v577_v50 }
 0x511   : > { %1737 = vtanh.f32 %v587_v52 }
 0x51b   : > { %v1738_v53 = vpop.eup %1737 }
 0x51c   : > { %590 = vrot.lane.b32.xlu0 %v1738_v53, %s1955_s30 }
 0x58e   : > { %v591_v54 = vpop.permute.xlu0 %590 }
 0x58f   : > { %v593_v55 = vmul.f32 %v1736_v47, %v591_v54 }
 0x591   : > { %595 = vrot.lane.b32.xlu1 %v593_v55, %s1956_s12 }
 0x603   : > { %v596_v56 = vpop.permute.xlu1 %595 }
 0x604   : > { %599 = vst.msk [vmem:[%s598_s24] sm:$0x3] %vm491_vm2, %v596_v56  ;;  %1539 = vmatmul.mubr.msk.f32.vlgmr.msra.gmra.mrb[2].mxu1 %vm295_vm1, %v596_v56  ;;  %s2317_s24 = scalar_select %p2431_p5, 5, 2 }
 0x605   : > { %1630 = vmatpush3.bf16.msra.mxu1 %v2192_v12  ;;  %1560 = vmatprep.mubr.msk.f32.mxu1 %vm1953_vm0, %v1954_v1 }
 0x606   : > { %1631 = vmatprep.subr.bf16.mxu1 %v1952_v0  ;;  %s1434_s27 = sshll.u32 %s2317_s24, 1 }
 0x607   : > { %s923_s10 = scalar_lea.vmem [#allocation2], %s1434_s27  ;;  %s1026_s13 = scalar_lea.vmem %s2232_s26, %s1434_s27 [#allocation9] }
 0x608   : > { %v924_v51 = vld [vmem:[%s923_s10] sm:$0x3] }
 0x609   : > { %1633 = vmatpush3.bf16.msra.mxu1 %v2195_v14 }
 0x60a   : > { %1640 = vmatprep.subr.bf16.mxu1 %v1952_v0 }
 0x6d7   : > { %v672_v58 = vpop.f32.mrb[2].mxu1 }
 0x6d8   : > { %v676_v59 = vadd.f32 %v672_v58, %v603_v57  ;;  %v1540_v60 = vpop.f32.mrb[3].mxu1 }
 0x6da   : > { %1739 = vtanh.f32 %v676_v59  ;;  %v1427_v62 = vmul.f32 -1.442695, %v676_v59 }
 0x6dc   : > { %1741 = vpow2.f32 %v1427_v62 }
 0x6e4   : > { %v1740_v61 = vpop.eup %1739 }
 0x6e5   : > { %686 = vrot.lane.b32.xlu0 %v1740_v61, %s1955_s30 }
 0x6e6   : > { %v1742_v63 = vpop.eup %1741 }
 0x6e7   : > { %v680_v2 = vadd.f32 1.0, %v1742_v63 }
 0x6e9   : > { %1743 = vrcp.f32 %v680_v2 }
 0x6f3   : > { %v1744_v3 = vpop.eup %1743 }
 0x6f4   : > { %v684_v6 = vmul.f32 %v1744_v3, %v587_v52 }
 0x757   : > { %v687_v4 = vpop.permute.xlu0 %686 }
 0x758   : > { %v689_v5 = vmul.f32 %v1744_v3, %v687_v4 }
 0x75a   : > { %691 = vrot.lane.b32.xlu1 %v689_v5, %s1956_s12 }
 0x7cc   : > { %v692_v7 = vpop.permute.xlu1 %691 }
 0x7cd   : > { %v694_v8 = vadd.f32 %v692_v7, %v684_v6 }
 0x7cf   : > { %1745 = vtanh.f32 %v694_v8 }
 0x7d9   : > { %v1746_v9 = vpop.eup %1745 }
 0x7da   : > { %697 = vrot.lane.b32.xlu0 %v1746_v9, %s1955_s30 }
 0x84c   : > { %v698_v10 = vpop.permute.xlu0 %697 }
 0x84d   : > { %v700_v11 = vmul.f32 %v1744_v3, %v698_v10 }
 0x84f   : > { %702 = vrot.lane.b32.xlu1 %v700_v11, %s1956_s12 }
 0x8c1   : > { %v703_v13 = vpop.permute.xlu1 %702 }
 0x8c2   : > { %706 = vst.msk [vmem:[%s705_s20] sm:$0x3] %vm491_vm2, %v703_v13  ;;  %1550 = vmatmul.mubr.msk.f32.vlgmr.msra.gmra.mrb[4].mxu0 %vm295_vm1, %v703_v13  ;;  %s2329_s20 = scalar_select %p2432_p10, 6, 1 }
 0x8c3   : > { %1636 = vmatpush3.bf16.msra.mxu0 %v2192_v12  ;;  %1571 = vmatprep.mubr.msk.f32.mxu0 %vm1953_vm0, %v1954_v1 }
 0x8c4   : > { %1637 = vmatprep.subr.bf16.mxu0 %v1952_v0  ;;  %s1437_s5 = sshll.u32 %s2329_s20, 1 }
 0x8c5   : > { %s1030_s11 = scalar_lea.vmem [#allocation2], %s1437_s5  ;;  %s1133_s7 = scalar_lea.vmem %s2232_s26, %s1437_s5 [#allocation9] }
 0x8c6   : > { %v1031_v3 = vld [vmem:[%s1030_s11] sm:$0x3] }
 0x8c7   : > { %1639 = vmatpush3.bf16.msra.mxu0 %v2195_v14 }
 0x8c8   : > { %1646 = vmatprep.subr.bf16.mxu0 %v1952_v0 }
 0x995   : > { %v779_v16 = vpop.f32.mrb[4].mxu0 }
 0x996   : > { %v783_v17 = vadd.f32 %v779_v16, %v710_v15  ;;  %v1551_v18 = vpop.f32.mrb[5].mxu0 }
 0x998   : > { %1747 = vtanh.f32 %v783_v17  ;;  %v1430_v20 = vmul.f32 -1.442695, %v783_v17 }
 0x99a   : > { %1749 = vpow2.f32 %v1430_v20 }
 0x9a2   : > { %v1748_v19 = vpop.eup %1747 }
 0x9a3   : > { %793 = vrot.lane.b32.xlu0 %v1748_v19, %s1955_s30 }
 0x9a4   : > { %v1750_v21 = vpop.eup %1749 }
 0x9a5   : > { %v787_v22 = vadd.f32 1.0, %v1750_v21 }
 0x9a7   : > { %1751 = vrcp.f32 %v787_v22 }
 0x9b1   : > { %v1752_v23 = vpop.eup %1751 }
 0x9b2   : > { %v791_v26 = vmul.f32 %v1752_v23, %v694_v8 }
 0xa15   : > { %v794_v24 = vpop.permute.xlu0 %793 }
 0xa16   : > { %v796_v25 = vmul.f32 %v1752_v23, %v794_v24 }
 0xa18   : > { %798 = vrot.lane.b32.xlu1 %v796_v25, %s1956_s12 }
 0xa8a   : > { %v799_v27 = vpop.permute.xlu1 %798 }
 0xa8b   : > { %v801_v28 = vadd.f32 %v799_v27, %v791_v26 }
 0xa8d   : > { %1753 = vtanh.f32 %v801_v28 }
 0xa97   : > { %v1754_v29 = vpop.eup %1753 }
 0xa98   : > { %804 = vrot.lane.b32.xlu0 %v1754_v29, %s1955_s30 }
 0xb0a   : > { %v805_v30 = vpop.permute.xlu0 %804 }
 0xb0b   : > { %v807_v31 = vmul.f32 %v1752_v23, %v805_v30 }
 0xb0d   : > { %809 = vrot.lane.b32.xlu1 %v807_v31, %s1956_s12 }
 0xb7f   : > { %v810_v32 = vpop.permute.xlu1 %809 }
 0xb80   : > { %813 = vst.msk [vmem:[%s812_s14] sm:$0x3] %vm491_vm2, %v810_v32  ;;  %1561 = vmatmul.mubr.msk.f32.vlgmr.msra.gmra.mrb[4].mxu1 %vm295_vm1, %v810_v32  ;;  %s2341_s14 = scalar_select %p2433_p8, 7, 0 }
 0xb81   : > { %1642 = vmatpush3.bf16.msra.mxu1 %v2192_v12  ;;  %1582 = vmatprep.mubr.msk.f32.mxu1 %vm1953_vm0, %v1954_v1 }
 0xb82   : > { %1643 = vmatprep.subr.bf16.mxu1 %v1952_v0  ;;  %s1440_s23 = sshll.u32 %s2341_s14, 1 }
 0xb83   : > { %s1137_s28 = scalar_lea.vmem [#allocation2], %s1440_s23  ;;  %s1240_s24 = scalar_lea.vmem %s2232_s26, %s1440_s23 [#allocation9] }
 0xb84   : > { %v1138_v23 = vld [vmem:[%s1137_s28] sm:$0x3] }
 0xb85   : > { %1645 = vmatpush3.bf16.msra.mxu1 %v2195_v14 }
 0xc53   : > { %v886_v34 = vpop.f32.mrb[4].mxu1 }
 0xc54   : > { %v890_v35 = vadd.f32 %v886_v34, %v817_v33  ;;  %v1562_v36 = vpop.f32.mrb[5].mxu1 }
 0xc56   : > { %1755 = vtanh.f32 %v890_v35  ;;  %v1433_v38 = vmul.f32 -1.442695, %v890_v35 }
 0xc58   : > { %1757 = vpow2.f32 %v1433_v38 }
 0xc60   : > { %v1756_v37 = vpop.eup %1755 }
 0xc61   : > { %900 = vrot.lane.b32.xlu0 %v1756_v37, %s1955_s30 }
 0xc62   : > { %v1758_v39 = vpop.eup %1757 }
 0xc63   : > { %v894_v40 = vadd.f32 1.0, %v1758_v39 }
 0xc65   : > { %1759 = vrcp.f32 %v894_v40 }
 0xc6f   : > { %v1760_v41 = vpop.eup %1759 }
 0xc70   : > { %v898_v44 = vmul.f32 %v1760_v41, %v801_v28 }
 0xcd3   : > { %v901_v42 = vpop.permute.xlu0 %900 }
 0xcd4   : > { %v903_v43 = vmul.f32 %v1760_v41, %v901_v42 }
 0xcd6   : > { %905 = vrot.lane.b32.xlu1 %v903_v43, %s1956_s12 }
 0xd48   : > { %v906_v45 = vpop.permute.xlu1 %905 }
 0xd49   : > { %v908_v46 = vadd.f32 %v906_v45, %v898_v44 }
 0xd4b   : > { %1761 = vtanh.f32 %v908_v46 }
 0xd55   : > { %v1762_v47 = vpop.eup %1761 }
 0xd56   : > { %911 = vrot.lane.b32.xlu0 %v1762_v47, %s1955_s30 }
 0xdc8   : > { %v912_v48 = vpop.permute.xlu0 %911 }
 0xdc9   : > { %v914_v49 = vmul.f32 %v1760_v41, %v912_v48 }
 0xdcb   : > { %916 = vrot.lane.b32.xlu1 %v914_v49, %s1956_s12 }
 0xe3d   : > { %v917_v50 = vpop.permute.xlu1 %916 }
 0xe3e   : > { %920 = vst.msk [vmem:[%s919_s9] sm:$0x3] %vm491_vm2, %v917_v50  ;;  %1572 = vmatmul.mubr.msk.f32.vlgmr.msra.gmra.mrb[6].mxu0 %vm295_vm1, %v917_v50  ;;  %s1256_s9 = sshll.u32 %s2232_s26, 4  ;;  %s2360_s9 = int_to_ptr.vmem [resolvable:$true] %s1256_s9 }
 0xe3f   : > { %1648 = vmatpush3.bf16.msra.mxu0 %v2192_v12  ;;  %1593 = vmatprep.mubr.msk.f32.mxu0 %vm1953_vm0, %v1954_v1  ;;  %s1875_s20 = scalar_lea.vmem %s2360_s9, 256 }
 0xe40   : > { %1649 = vmatprep.subr.bf16.mxu0 %v1952_v0  ;;  %p1876_p7 = scmp.ne.s32.totalorder %s2360_s9, %s1875_s20 }
 0xe42   : > { %p1877_p12 = pnand %p1876_p7, %p2434_p3 }
 0xe43   : > { %1651 = vmatpush3.bf16.msra.mxu0 %v2195_v14 }
 0xe44   : > { %p1878_p6 = pneg %p1877_p12 }
 0xf11   : > { %v993_v52 = vpop.f32.mrb[6].mxu0 }
 0xf12   : > { %v997_v53 = vadd.f32 %v993_v52, %v924_v51  ;;  %v1573_v54 = vpop.f32.mrb[7].mxu0 }
 0xf14   : > { %1763 = vtanh.f32 %v997_v53  ;;  %v1436_v12 = vmul.f32 -1.442695, %v997_v53 }
 0xf16   : > { %1765 = vpow2.f32 %v1436_v12 }
 0xf1e   : > { %v1764_v55 = vpop.eup %1763 }
 0xf1f   : > { %1007 = vrot.lane.b32.xlu0 %v1764_v55, %s1955_s30 }
 0xf20   : > { %v1766_v1 = vpop.eup %1765 }
 0xf21   : > { %v1001_v0 = vadd.f32 1.0, %v1766_v1 }
 0xf23   : > { %1767 = vrcp.f32 %v1001_v0 }
 0xf2d   : > { %v1768_v14 = vpop.eup %1767 }
 0xf2e   : > { %v1005_v58 = vmul.f32 %v1768_v14, %v908_v46 }
 0xf91   : > { %v1008_v56 = vpop.permute.xlu0 %1007 }
 0xf92   : > { %v1010_v57 = vmul.f32 %v1768_v14, %v1008_v56 }
 0xf94   : > { %1012 = vrot.lane.b32.xlu1 %v1010_v57, %s1956_s12 }
0x1006   : > { %v1013_v59 = vpop.permute.xlu1 %1012 }
0x1007   : > { %v1015_v60 = vadd.f32 %v1013_v59, %v1005_v58 }
0x1009   : > { %1769 = vtanh.f32 %v1015_v60 }
0x1013   : > { %v1770_v61 = vpop.eup %1769 }
0x1014   : > { %1018 = vrot.lane.b32.xlu0 %v1770_v61, %s1955_s30 }
0x1086   : > { %v1019_v62 = vpop.permute.xlu0 %1018 }
0x1087   : > { %v1021_v63 = vmul.f32 %v1768_v14, %v1019_v62 }
0x1089   : > { %1023 = vrot.lane.b32.xlu1 %v1021_v63, %s1956_s12 }
0x10fb   : > { %v1024_v2 = vpop.permute.xlu1 %1023 }
0x10fc   : > { %1027 = vst.msk [vmem:[%s1026_s13] sm:$0x3] %vm491_vm2, %v1024_v2  ;;  %1583 = vmatmul.mubr.msk.f32.vlgmr.msra.gmra.mrb[6].mxu1 %vm295_vm1, %v1024_v2  ;;  %s2358_s13 = scalar_lea.hbm %s2409_s4, %s1450_s6 }
0x11cf   : > { %v1100_v4 = vpop.f32.mrb[6].mxu1 }
0x11d0   : > { %v1104_v5 = vadd.f32 %v1100_v4, %v1031_v3  ;;  %v1584_v6 = vpop.f32.mrb[7].mxu1 }
0x11d2   : > { %1771 = vtanh.f32 %v1104_v5  ;;  %v1439_v8 = vmul.f32 -1.442695, %v1104_v5 }
0x11d4   : > { %1773 = vpow2.f32 %v1439_v8 }
0x11dc   : > { %v1772_v7 = vpop.eup %1771 }
0x11dd   : > { %1114 = vrot.lane.b32.xlu0 %v1772_v7, %s1955_s30 }
0x11de   : > { %v1774_v9 = vpop.eup %1773 }
0x11df   : > { %v1108_v10 = vadd.f32 1.0, %v1774_v9 }
0x11e1   : > { %1775 = vrcp.f32 %v1108_v10 }
0x11eb   : > { %v1776_v11 = vpop.eup %1775 }
0x11ec   : > { %v1112_v16 = vmul.f32 %v1776_v11, %v1015_v60 }
0x124f   : > { %v1115_v13 = vpop.permute.xlu0 %1114 }
0x1250   : > { %v1117_v15 = vmul.f32 %v1776_v11, %v1115_v13 }
0x1252   : > { %1119 = vrot.lane.b32.xlu1 %v1117_v15, %s1956_s12 }
0x12c4   : > { %v1120_v17 = vpop.permute.xlu1 %1119 }
0x12c5   : > { %v1122_v18 = vadd.f32 %v1120_v17, %v1112_v16 }
0x12c7   : > { %1777 = vtanh.f32 %v1122_v18 }
0x12d1   : > { %v1778_v19 = vpop.eup %1777 }
0x12d2   : > { %1125 = vrot.lane.b32.xlu0 %v1778_v19, %s1955_s30 }
0x1344   : > { %v1126_v20 = vpop.permute.xlu0 %1125 }
0x1345   : > { %v1128_v21 = vmul.f32 %v1776_v11, %v1126_v20 }
0x1347   : > { %1130 = vrot.lane.b32.xlu1 %v1128_v21, %s1956_s12 }
0x13b9   : > { %v1131_v22 = vpop.permute.xlu1 %1130 }
0x13ba   : > { %1134 = vst.msk [vmem:[%s1133_s7] sm:$0x3] %vm491_vm2, %v1131_v22  ;;  %1594 = vmatmul.mubr.msk.f32.vlgmr.msra.gmra.mrb[8].mxu0 %vm295_vm1, %v1131_v22 }
0x148d   : > { %v1207_v24 = vpop.f32.mrb[8].mxu0 }
0x148e   : > { %v1211_v25 = vadd.f32 %v1207_v24, %v1138_v23  ;;  %v1595_v26 = vpop.f32.mrb[9].mxu0 }
0x1490   : > { %1779 = vtanh.f32 %v1211_v25  ;;  %v1442_v28 = vmul.f32 -1.442695, %v1211_v25 }
0x1492   : > { %1781 = vpow2.f32 %v1442_v28 }
0x149a   : > { %v1780_v27 = vpop.eup %1779 }
0x149b   : > { %1221 = vrot.lane.b32.xlu0 %v1780_v27, %s1955_s30 }
0x149c   : > { %v1782_v29 = vpop.eup %1781 }
0x149d   : > { %v1215_v30 = vadd.f32 1.0, %v1782_v29 }
0x149f   : > { %1783 = vrcp.f32 %v1215_v30 }
0x14a9   : > { %v1784_v31 = vpop.eup %1783 }
0x14aa   : > { %v1219_v34 = vmul.f32 %v1784_v31, %v1122_v18 }
0x150d   : > { %v1222_v32 = vpop.permute.xlu0 %1221 }
0x150e   : > { %v1224_v33 = vmul.f32 %v1784_v31, %v1222_v32 }
0x1510   : > { %1226 = vrot.lane.b32.xlu1 %v1224_v33, %s1956_s12 }
0x1582   : > { %v1227_v35 = vpop.permute.xlu1 %1226 }
0x1583   : > { %v1229_v36 = vadd.f32 %v1227_v35, %v1219_v34 }
0x1585   : > { %1785 = vtanh.f32 %v1229_v36 }
0x158f   : > { %v1786_v37 = vpop.eup %1785 }
0x1590   : > { %1232 = vrot.lane.b32.xlu0 %v1786_v37, %s1955_s30  ;;  %s1243_s30 = scalar_lea.sflag [#allocation5], %s2181_s21 }
0x1602   : > { %v1233_v38 = vpop.permute.xlu0 %1232 }
0x1603   : > { %v1235_v39 = vmul.f32 %v1784_v31, %v1233_v38 }
0x1605   : > { %1237 = vrot.lane.b32.xlu1 %v1235_v39, %s1956_s12  ;;  %s1879_s12 = sshll.u32 %s1957_s8, 4  ;;  %s1880_s12 = int_to_ptr.vmem [resolvable:$false] %s1879_s12 }
0x1606   : > { %s1881_s26 = scalar_lea.vmem %s1880_s12, 512  ;;  %p1882_p0 = scmp.lt.s32.totalorder %s2360_s9, %s1880_s12 }
0x1607   : > { %p1883_p9 = scmp.lt.s32.totalorder %s1881_s26, %s1875_s20 }
0x1609   : > { %p1884_p1 = por %p1883_p9, %p1882_p0 }
0x160b   : > { %p1885_p11 = pnand %p1884_p1, %p1878_p6 }
0x1677   : > { %v1238_v40 = vpop.permute.xlu1 %1237 }
0x1678   : > { %1241 = vst.msk [vmem:[%s1240_s24] sm:$0x3] %vm491_vm2, %v1238_v40 }
0x1679   : > { %1888 = shalt.err (!%p1885_p11)
}
0x167a   : > { %s1889_s5 = scalar_lea.hbm %s2358_s13, 256  ;;  %s1893_s14 = scalar_lea.hbm %s2409_s4, 512 }
0x167b   : > { %p1890_p13 = scmp.ne.s32.totalorder %s2358_s13, %s1889_s5  ;;  %p1894_p5 = scmp.lt.u32.totalorder %s2358_s13, %s2409_s4 }
0x167c   : > { %p1895_p10 = scmp.lt.u32.totalorder %s1893_s14, %s1889_s5  ;;  %p1897_p7 = scmp.lt.u32.totalorder %s1889_s5, %s2358_s13 }
0x167d   : > { %p1891_p4 = pnand %p1890_p13, %p2434_p3 }
0x167e   : > { %p1896_p8 = por %p1895_p10, %p1894_p5 }
0x167f   : > { %p1892_p2 = pneg %p1891_p4 }
0x1680   : > { %p1898_p12 = por %p1897_p7, %p1896_p8 }
0x1682   : > { %p1899_p6 = pnand %p1898_p12, %p1892_p2 }
0x1684   : > { %1902 = shalt.err (!%p1899_p6)
}
0x1685   : > { %s1958_s6 = smov 128   ;;  %s1959_s24 = smov 8  }
0x1686   : > { %1660 = dma.vmem_to_hbm [thread:$0]  (%p2434_p3), %s2360_s9, 256, %s2358_s13, %s1243_s30, %s1958_s6, %s1958_s6, %s1959_s24  }
0x1687 PF: > { %s1271_s27 = sand.u32 1, %s1933_s15   ;;  %p2435_p0 = scmp.ne.s32.totalorder %s2417_s29, 0 }
0x1688   : > { %p2436_p9 = scmp.ge.s32.totalorder %s1945_s18, 2  ;;  %s1272_s10 = scalar_lea.sflag [#allocation5], %s1271_s27 }
0x168a   : > { %p1674_p1 = pnand %p2436_p9, %p2435_p0 }
0x168c   : > { %1928 = dma.done.wait (!%p1674_p1), %s1272_s10, 256  }
0x168d   : > { %1930 = vsyncadd (!%p1674_p1), %s1272_s10, 4294967040  ;;  %p18_p11 = scmp.ge.s32.totalorder %s2006_s19, 4   ;;  %s2437_s15 = smov %s1937_s16 }
0x168e   : > { %s2438_s16 = smov %s1941_s17  ;;  %s2439_s17 = smov %s2015_s22 }
0x168f   : > { %s2440_s18 = smov %s2006_s19  ;;  %20 = sbr.rel (!%p18_p11) target bundleno = 6 (0x6), region = 116 }
0x1696   :  { %1277 = vsyncpa [#allocation4], 1 }
0x1697   :  { %1279 = vsyncpa [#allocation4 + $0x1], 1 }
0x1698   :  { %1280 = vsyncpa [#allocation7], 1 }
0x1699   :  { %1282 = vsyncpa [#allocation7 + $0x1], 1 }
0x169a   :  { %1283 = vsyncpa [#allocation5], 1 }
0x169b   :  { %1285 = vsyncpa [#allocation5 + $0x1], 1 }

</bundles_post_ra>
